<compile_context>
chip_gen: v6e
topology: v6e:2x2x1
jax: 0.10.0
libtpu: 0.0.40
codegen_flags: <defaults>
</compile_context>

<pallas_src>
import functools

import jax
import jax.numpy as jnp
from jax.experimental import pallas as pl
from jax.experimental.pallas import tpu as pltpu


LANE = 128                              # feature / lane padding granularity
ROW_PAD = 256                           # node-count padding granularity (128-multiple)
H_RESIDENT_BYTES = 8 * 1024 * 1024      # bf16 budget for keeping h resident in VMEM
VMEM_LIMIT = 48 * 1024 * 1024           # scoped VMEM limit for the N^2 passes


def _round_up(x: int, m: int) -> int:
    return (x + m - 1) // m * m


def _largest_tile(n_pad: int, cap: int) -> int:
    """Largest tile <= cap that divides n_pad (n_pad is a multiple of 256)."""
    t = min(cap, n_pad)
    while n_pad % t != 0:
        t //= 2
    return t


def _pick_row_tile(n_pad: int, cap: int = 512) -> int:
    """Row tile: prefer an even number of row tiles (v7x 2-TC split)."""
    t = cap
    while t >= 128:
        if t <= n_pad and n_pad % t == 0 and (n_pad // t) % 2 == 0:
            return t
        t //= 2
    return _largest_tile(n_pad, cap)


# --------------------------------------------------------------------------
# Kernel 1: per-node linear transform  z = x @ W + b   (bf16 output)
# --------------------------------------------------------------------------
def _linear_kernel(x_ref, w_ref, b_ref, z_ref):
    z = jnp.dot(x_ref[...], w_ref[...], preferred_element_type=jnp.float32) + b_ref[...]
    z_ref[...] = z.astype(z_ref.dtype)


def _linear(x_pad, w_pad, b_pad, *, tile_m):
    n_pad, c_in = x_pad.shape            # c_in intentionally NOT padded to 128
    c_pad = w_pad.shape[1]
    return pl.pallas_call(
        _linear_kernel,
        out_shape=jax.ShapeDtypeStruct((n_pad, c_pad), jnp.bfloat16),
        grid_spec=pltpu.PrefetchScalarGridSpec(
            num_scalar_prefetch=0,
            grid=(n_pad // tile_m,),
            in_specs=[
                pl.BlockSpec((tile_m, c_in), lambda i: (i, 0)),
                # constant index maps -> weights / bias stay resident in VMEM
                pl.BlockSpec((c_in, c_pad), lambda i: (0, 0)),
                pl.BlockSpec((1, c_pad), lambda i: (0, 0)),
            ],
            out_specs=pl.BlockSpec((tile_m, c_pad), lambda i: (i, 0)),
        ),
        compiler_params=pltpu.CompilerParams(dimension_semantics=("parallel",)),
    )(x_pad, w_pad, b_pad)


# --------------------------------------------------------------------------
# Aggregation kernels.  grid = (row_tiles, k_tiles), f32 VMEM accumulator,
# self-loop handled as "+ h_i" / "+1 degree", adj streamed in bf16 onto MXU.
# --------------------------------------------------------------------------
def _hk_block(hk_ref, tile_k, h_resident):
    """Current neighbour-feature panel for reduction step k."""
    if h_resident:
        start = pl.multiple_of(pl.program_id(1) * tile_k, tile_k)
        return hk_ref[pl.ds(start, tile_k), :]
    return hk_ref[...]


def _agg_fused_kernel(adj_ref, hk_ref, hi_ref, w2_ref, b2_ref,
                      z2_ref, invdeg_ref, acc_ref, deg_ref,
                      *, tile_k, h_resident):
    """Layer-1 aggregation + relu, fused with the layer-2 projection.
    Also emits inv_deg (computed once, reused by the final aggregation)."""
    k = pl.program_id(1)

    @pl.when(k == 0)
    def _():
        # Self-loop contribution of (adj + I): "+ h_i" and "+1" on the degree.
        acc_ref[...] = hi_ref[...].astype(jnp.float32)
        deg_ref[...] = jnp.ones_like(deg_ref)

    adj = adj_ref[...]                                   # bf16, {0,1} -> exact
    hk = _hk_block(hk_ref, tile_k, h_resident)           # bf16
    acc_ref[...] += jnp.dot(adj, hk, preferred_element_type=jnp.float32)
    # Row-sum for the degree (f32 accumulation; only exists in this layer-1 pass).
    deg_ref[...] += jnp.sum(adj, axis=-1, keepdims=True, dtype=jnp.float32)

    @pl.when(k == pl.num_programs(1) - 1)
    def _():
        inv = pl.reciprocal(deg_ref[...], approx=True)   # EUP slot
        invdeg_ref[...] = inv
        h1 = jnp.maximum(acc_ref[...] * inv, 0.0)        # layer-1 output (relu)
        # Fused layer-2 linear (W2/b2 resident): z2 = h1 @ W2 + b2
        z2 = jnp.dot(h1, w2_ref[...], preferred_element_type=jnp.float32) + b2_ref[...]
        z2_ref[...] = z2.astype(z2_ref.dtype)


def _agg_final_kernel(adj_ref, hk_ref, hi_ref, invdeg_ref, o_ref, acc_ref,
                      *, tile_k, h_resident):
    """Layer-2 aggregation + relu, reusing the precomputed inv_deg."""
    k = pl.program_id(1)

    @pl.when(k == 0)
    def _():
        acc_ref[...] = hi_ref[...].astype(jnp.float32)

    acc_ref[...] += jnp.dot(adj_ref[...], _hk_block(hk_ref, tile_k, h_resident),
                            preferred_element_type=jnp.float32)

    @pl.when(k == pl.num_programs(1) - 1)
    def _():
        o_ref[...] = jnp.maximum(acc_ref[...] * invdeg_ref[...], 0.0).astype(o_ref.dtype)


def _agg_specs(n_pad, c_pad, tile_i, tile_k, h_resident):
    adj_spec = pl.BlockSpec((tile_i, tile_k), lambda i, k: (i, k))
    if h_resident:
        # whole neighbour-feature matrix fetched once, stays resident in VMEM
        hk_spec = pl.BlockSpec((n_pad, c_pad), lambda i, k: (0, 0))
    else:
        hk_spec = pl.BlockSpec((tile_k, c_pad), lambda i, k: (k, 0))
    hi_spec = pl.BlockSpec((tile_i, c_pad), lambda i, k: (i, 0))   # self-loop rows
    return adj_spec, hk_spec, hi_spec


def _aggregate_fused(adj, h, w2, b2, *, tile_i, tile_k, h_resident):
    n_pad = adj.shape[0]
    c_pad = h.shape[1]
    adj_spec, hk_spec, hi_spec = _agg_specs(n_pad, c_pad, tile_i, tile_k, h_resident)
    kernel = functools.partial(_agg_fused_kernel, tile_k=tile_k, h_resident=h_resident)
    return pl.pallas_call(
        kernel,
        out_shape=(jax.ShapeDtypeStruct((n_pad, c_pad), jnp.bfloat16),   # z2
                   jax.ShapeDtypeStruct((n_pad, 1), jnp.float32)),       # inv_deg
        grid_spec=pltpu.PrefetchScalarGridSpec(
            num_scalar_prefetch=0,
            grid=(n_pad // tile_i, n_pad // tile_k),
            in_specs=[
                adj_spec,
                hk_spec,
                hi_spec,
                pl.BlockSpec((c_pad, c_pad), lambda i, k: (0, 0)),   # W2 resident
                pl.BlockSpec((1, c_pad), lambda i, k: (0, 0)),       # b2 resident
            ],
            out_specs=[
                pl.BlockSpec((tile_i, c_pad), lambda i, k: (i, 0)),
                pl.BlockSpec((tile_i, 1), lambda i, k: (i, 0)),
            ],
            scratch_shapes=[
                pltpu.VMEM((tile_i, c_pad), jnp.float32),   # accumulator
                pltpu.VMEM((tile_i, 1), jnp.float32),       # degree accumulator
            ],
        ),
        compiler_params=pltpu.CompilerParams(
            dimension_semantics=("parallel", "arbitrary"),
            vmem_limit_bytes=VMEM_LIMIT,
        ),
    )(adj, h, h, w2, b2)


def _aggregate_final(adj, h, inv_deg, *, tile_i, tile_k, h_resident):
    n_pad = adj.shape[0]
    c_pad = h.shape[1]
    adj_spec, hk_spec, hi_spec = _agg_specs(n_pad, c_pad, tile_i, tile_k, h_resident)
    kernel = functools.partial(_agg_final_kernel, tile_k=tile_k, h_resident=h_resident)
    return pl.pallas_call(
        kernel,
        out_shape=jax.ShapeDtypeStruct((n_pad, c_pad), jnp.float32),
        grid_spec=pltpu.PrefetchScalarGridSpec(
            num_scalar_prefetch=0,
            grid=(n_pad // tile_i, n_pad // tile_k),
            in_specs=[
                adj_spec,
                hk_spec,
                hi_spec,
                pl.BlockSpec((tile_i, 1), lambda i, k: (i, 0)),      # inv_deg
            ],
            out_specs=pl.BlockSpec((tile_i, c_pad), lambda i, k: (i, 0)),
            scratch_shapes=[pltpu.VMEM((tile_i, c_pad), jnp.float32)],
        ),
        compiler_params=pltpu.CompilerParams(
            dimension_semantics=("parallel", "arbitrary"),
            vmem_limit_bytes=VMEM_LIMIT,
        ),
    )(adj, h, h, inv_deg)


# --------------------------------------------------------------------------
# Wrapper: padding glue + the two GCN layers (3 pallas_calls total)
# --------------------------------------------------------------------------
def gcn_forward(node_feats, adj, w1, b1, w2, b2):
    """node_feats: [N, c_in], adj: [N, N].
    w1: [c_out, c_in], b1: [c_out], w2: [c_out, c_out], b2: [c_out]
    (PyTorch nn.Linear layout; transposed / padded here as glue)."""
    n, c_in = node_feats.shape
    c_out = w1.shape[0]

    n_pad = _round_up(n, ROW_PAD)
    c_pad = _round_up(c_out, LANE)

    f32 = jnp.float32
    # rows padded; c_in left at its real width (streamed un-padded)
    x_p = jnp.pad(node_feats.astype(f32), ((0, n_pad - n), (0, 0)))
    # adj values are {0,1} -> bf16 is exact; halves HBM/VMEM for the N^2 operand
    adj_p = jnp.pad(adj.astype(f32), ((0, n_pad - n), (0, n_pad - n))).astype(jnp.bfloat16)
    w1_p = jnp.pad(w1.T.astype(f32), ((0, 0), (0, c_pad - c_out)))
    b1_p = jnp.pad(b1.astype(f32).reshape(1, c_out), ((0, 0), (0, c_pad - c_out)))
    w2_p = jnp.pad(w2.T.astype(f32), ((0, c_pad - c_out), (0, c_pad - c_out)))
    b2_p = jnp.pad(b2.astype(f32).reshape(1, c_out), ((0, 0), (0, c_pad - c_out)))

    tile_i = _pick_row_tile(n_pad, cap=512)
    tile_k = _largest_tile(n_pad, cap=2048)
    tile_m = _largest_tile(n_pad, cap=1024)
    h_resident = (n_pad * c_pad * 2) <= H_RESIDENT_BYTES   # bf16 residency budget

    # layer-1 projection
    z1 = _linear(x_p, w1_p, b1_p, tile_m=tile_m)
    # layer-1 aggregation + relu, fused layer-2 projection; emits inv_deg once
    z2, inv_deg = _aggregate_fused(adj_p, z1, w2_p, b2_p,
                                   tile_i=tile_i, tile_k=tile_k, h_resident=h_resident)
    # layer-2 aggregation + relu
    out = _aggregate_final(adj_p, z2, inv_deg,
                           tile_i=tile_i, tile_k=tile_k, h_resident=h_resident)
    return out[:n, :c_out]


def gcn_reference(node_feats, adj, w1, b1, w2, b2):
    """Pure-JAX f32 reference mirroring the PyTorch module."""
    n = node_feats.shape[0]
    self_adj = adj + jnp.eye(n, dtype=adj.dtype)
    deg = self_adj.sum(-1, keepdims=True)

    h = node_feats @ w1.T + b1
    h = jax.nn.relu((self_adj @ h) / deg)

    h = h @ w2.T + b2
    h = jax.nn.relu((self_adj @ h) / deg)
    return h


if __name__ == "__main__":
    key = jax.random.PRNGKey(0)
    N, c_in, c_out = 8, 16, 32

    k_x, k_a, k_w1, k_b1, k_w2, k_b2 = jax.random.split(key, 6)

    node_feats = jax.random.normal(k_x, (N, c_in), dtype=jnp.float32)
    adj = (jax.random.uniform(k_a, (N, N)) > 0.5).astype(jnp.float32)

    # Deterministic PyTorch-Linear-style init: U(-1/sqrt(fan_in), 1/sqrt(fan_in))
    bnd1 = 1.0 / (c_in ** 0.5)
    w1 = jax.random.uniform(k_w1, (c_out, c_in), minval=-bnd1, maxval=bnd1, dtype=jnp.float32)
    b1 = jax.random.uniform(k_b1, (c_out,), minval=-bnd1, maxval=bnd1, dtype=jnp.float32)
    bnd2 = 1.0 / (c_out ** 0.5)
    w2 = jax.random.uniform(k_w2, (c_out, c_out), minval=-bnd2, maxval=bnd2, dtype=jnp.float32)
    b2 = jax.random.uniform(k_b2, (c_out,), minval=-bnd2, maxval=bnd2, dtype=jnp.float32)

    out = gcn_forward(node_feats, adj, w1, b1, w2, b2)
    out = jax.block_until_ready(out)

    ref = gcn_reference(node_feats, adj, w1, b1, w2, b2)
    assert out.shape == (N, c_out)
    # bf16 activations on the aggregation MXU path + approx reciprocal ->
    # relaxed tolerance vs the pure-f32 reference (typical error ~1e-3 rel).
    err = jnp.max(jnp.abs(out - ref))
    assert jnp.allclose(out, ref, atol=5e-2, rtol=5e-2), f"mismatch vs reference, max abs err={err}"

    print("KERNEL_OK")
</pallas_src>

<mosaic_0001>
module attributes {stable_mosaic.version = 11 : i64} {
  func.func @_linear_kernel(%arg0: i32, %arg1: memref<256x16xf32, #tpu.memory_space<vmem>>, %arg2: memref<16x128xf32, #tpu.memory_space<vmem>>, %arg3: memref<1x128xf32, #tpu.memory_space<vmem>>, %arg4: memref<256x128xbf16, #tpu.memory_space<vmem>>) attributes {dimension_semantics = [#tpu.dimension_semantics<parallel>], iteration_bounds = array<i64: 1>, scalar_prefetch = 0 : i64, scratch_operands = 0 : i64, tpu.core_type = #tpu.core_type<tc>, window_params = [{transform_indices = @transform_0, window_bounds = array<i64: 256, 16>}, {pipeline_mode = #tpu.pipeline_mode<synchronous>, transform_indices = @transform_1, window_bounds = array<i64: 16, 128>}, {pipeline_mode = #tpu.pipeline_mode<synchronous>, transform_indices = @transform_2, window_bounds = array<i64: 1, 128>}, {transform_indices = @transform_3, window_bounds = array<i64: 256, 128>}]} {
    %c0 = arith.constant 0 : index
    %c0_0 = arith.constant 0 : index
    %0 = vector.load %arg1[%c0, %c0_0] : memref<256x16xf32, #tpu.memory_space<vmem>>, vector<256x16xf32>
    %c0_1 = arith.constant 0 : index
    %c0_2 = arith.constant 0 : index
    %1 = vector.load %arg2[%c0_1, %c0_2] : memref<16x128xf32, #tpu.memory_space<vmem>>, vector<16x128xf32>
    %cst = arith.constant dense<0.000000e+00> : vector<256x128xf32>
    %2 = tpu.matmul %0, %1, %cst {dimension_numbers = #tpu.dot_dimension_numbers<[1], [0], [0], [1], [0, 0, 1, 1], [], []>} : vector<256x16xf32>, vector<16x128xf32>, vector<256x128xf32> -> vector<256x128xf32>
    %c0_3 = arith.constant 0 : index
    %c0_4 = arith.constant 0 : index
    %3 = vector.load %arg3[%c0_3, %c0_4] : memref<1x128xf32, #tpu.memory_space<vmem>>, vector<1x128xf32>
    %4 = vector.broadcast %3 : vector<1x128xf32> to vector<256x128xf32>
    %5 = arith.addf %2, %4 : vector<256x128xf32>
    %6 = arith.truncf %5 : vector<256x128xf32> to vector<256x128xbf16>
    %c0_5 = arith.constant 0 : index
    %c0_6 = arith.constant 0 : index
    %7 = vector.load %arg4[%c0_5, %c0_6] : memref<256x128xbf16, #tpu.memory_space<vmem>>, vector<256x128xbf16>
    tpu.vector_store %arg4[%c0_5, %c0_6], %6 {strides = array<i32>} : memref<256x128xbf16, #tpu.memory_space<vmem>>, vector<256x128xbf16>,
    return
  }
  func.func @transform_0(%arg0: i32) -> (i32, i32) {
    %c0_i32 = arith.constant 0 : i32
    %c0_i32_0 = arith.constant 0 : i32
    return %arg0, %c0_i32 : i32, i32
  }
  func.func @transform_1(%arg0: i32) -> (i32, i32) {
    %c0_i32 = arith.constant 0 : i32
    %c0_i32_0 = arith.constant 0 : i32
    %c0_i32_1 = arith.constant 0 : i32
    return %c0_i32, %c0_i32_0 : i32, i32
  }
  func.func @transform_2(%arg0: i32) -> (i32, i32) {
    %c0_i32 = arith.constant 0 : i32
    %c0_i32_0 = arith.constant 0 : i32
    %c0_i32_1 = arith.constant 0 : i32
    return %c0_i32, %c0_i32_0 : i32, i32
  }
  func.func @transform_3(%arg0: i32) -> (i32, i32) {
    %c0_i32 = arith.constant 0 : i32
    %c0_i32_0 = arith.constant 0 : i32
    return %arg0, %c0_i32 : i32, i32
  }
}

</mosaic_0001>

<bundles_post_ra>
// kernel: tpu_custom_call.1
= control target key start
LH: loop header
LB: loop body
LE: loop exit
PB: predicated region body
PF: predicated region fallthrough
CT: control target
= control target key end

     0   :  { %vm56_vm0 = vcmask 130048   ;;  %s1058_s0 = inlined_call_operand.vmem [shape: f32[256,16], index: 0, kind: input, shape index: {}]   ;;  %s1059_s1 = inlined_call_operand.vmem [shape: f32[16,128], index: 1, kind: input, shape index: {}]   ;;  %s1060_s2 = inlined_call_operand.vmem [shape: f32[1,128], index: 2, kind: input, shape index: {}]   ;;  %s1061_s3 = inlined_call_operand.hbm [shape: bf16[256,128], index: 3, kind: output, shape index: {}]  }
   0x1   :  { %v48_v0 = vld [vmem:[%s1059_s1 + $0x8] sm:$0xff]  ;;  %v47_v1 = vld [vmem:[%s1059_s1] sm:$0xff]  ;;  %v17_v6 = vld [vmem:[%s1058_s0 + $0x10] sm:$0xff] }
   0x2   :  { %780 = vmatprep.subr.mxu0 %v48_v0  ;;  %832 = vmatprep.subr.mxu1 %v48_v0  ;;  %v15_v2 = vld [vmem:[%s1058_s0] sm:$0xff]  ;;  %v16_v4 = vld [vmem:[%s1058_s0 + $0x8] sm:$0xff]  ;;  %v33_v7 = vld [vmem:[%s1058_s0 + $0x90] sm:$0xff] }
   0x3   :  { %781 = vmatpush3.msra.mxu0 %v48_v0  ;;  %834 = vmatpush3.msra.mxu1 %v48_v0  ;;  %v31_v3 = vld [vmem:[%s1058_s0 + $0x80] sm:$0xff]  ;;  %v32_v5 = vld [vmem:[%s1058_s0 + $0x88] sm:$0xff]  ;;  %v18_v8 = vld [vmem:[%s1058_s0 + $0x18] sm:$0xff] }
   0x4   :  { %782 = vmatprep.subr.mxu0 %v47_v1  ;;  %833 = vmatprep.subr.mxu1 %v47_v1  ;;  %v34_v9 = vld [vmem:[%s1058_s0 + $0x98] sm:$0xff]  ;;  %v19_v10 = vld [vmem:[%s1058_s0 + $0x20] sm:$0xff]  ;;  %v20_v12 = vld [vmem:[%s1058_s0 + $0x28] sm:$0xff] }
   0x5   :  { %783 = vmatpush3.msra.mxu0 %v47_v1  ;;  %835 = vmatpush3.msra.mxu1 %v47_v1  ;;  %v35_v11 = vld [vmem:[%s1058_s0 + $0xa0] sm:$0xff]  ;;  %v36_v13 = vld [vmem:[%s1058_s0 + $0xa8] sm:$0xff] }
   0x6   :  { %784 = vmatprep.mubr.msk.f32.mxu0 %vm56_vm0, %v15_v2  ;;  %808 = vmatprep.mubr.msk.f32.mxu1 %vm56_vm0, %v31_v3 }
   0x7   :  { %785 = vmatmul.mubr.msk.f32.vlgmr.msra.gmra.mxu0 %vm56_vm0, %v16_v4  ;;  %809 = vmatmul.mubr.msk.f32.vlgmr.msra.gmra.mxu1 %vm56_vm0, %v32_v5 }
   0x8   :  { %787 = vmatprep.mubr.msk.f32.mxu0 %vm56_vm0, %v17_v6  ;;  %811 = vmatprep.mubr.msk.f32.mxu1 %vm56_vm0, %v33_v7 }
   0xb   :  { %788 = vmatmul.mubr.msk.f32.gmra.mxu0 %vm56_vm0, %v18_v8  ;;  %812 = vmatmul.mubr.msk.f32.gmra.mxu1 %vm56_vm0, %v34_v9 }
   0xc   :  { %790 = vmatprep.mubr.msk.f32.mxu0 %vm56_vm0, %v19_v10  ;;  %814 = vmatprep.mubr.msk.f32.mxu1 %vm56_vm0, %v35_v11 }
   0xd   :  { %8 = vsyncpa [#allocation3], 0  ;;  %v21_v14 = vld [vmem:[%s1058_s0 + $0x30] sm:$0xff]  ;;  %v22_v16 = vld [vmem:[%s1058_s0 + $0x38] sm:$0xff] }
   0xe   :  { %v37_v15 = vld [vmem:[%s1058_s0 + $0xb0] sm:$0xff]  ;;  %v38_v17 = vld [vmem:[%s1058_s0 + $0xb8] sm:$0xff]  ;;  %v23_v18 = vld [vmem:[%s1058_s0 + $0x40] sm:$0xff] }
   0xf   :  { %791 = vmatmul.mubr.msk.f32.gmra.mxu0 %vm56_vm0, %v20_v12  ;;  %815 = vmatmul.mubr.msk.f32.gmra.mxu1 %vm56_vm0, %v36_v13  ;;  %v39_v19 = vld [vmem:[%s1058_s0 + $0xc0] sm:$0xff]  ;;  %v24_v20 = vld [vmem:[%s1058_s0 + $0x48] sm:$0xff]  ;;  %v25_v22 = vld [vmem:[%s1058_s0 + $0x50] sm:$0xff] }
  0x10   :  { %793 = vmatprep.mubr.msk.f32.mxu0 %vm56_vm0, %v21_v14  ;;  %817 = vmatprep.mubr.msk.f32.mxu1 %vm56_vm0, %v37_v15  ;;  %v40_v21 = vld [vmem:[%s1058_s0 + $0xc8] sm:$0xff]  ;;  %v41_v23 = vld [vmem:[%s1058_s0 + $0xd0] sm:$0xff]  ;;  %v26_v24 = vld [vmem:[%s1058_s0 + $0x58] sm:$0xff] }
  0x11   :  { %v42_v25 = vld [vmem:[%s1058_s0 + $0xd8] sm:$0xff]  ;;  %v27_v26 = vld [vmem:[%s1058_s0 + $0x60] sm:$0xff]  ;;  %v28_v28 = vld [vmem:[%s1058_s0 + $0x68] sm:$0xff] }
  0x12   :  { %v43_v27 = vld [vmem:[%s1058_s0 + $0xe0] sm:$0xff]  ;;  %v44_v29 = vld [vmem:[%s1058_s0 + $0xe8] sm:$0xff]  ;;  %v29_v30 = vld [vmem:[%s1058_s0 + $0x70] sm:$0xff] }
  0x13   :  { %794 = vmatmul.mubr.msk.f32.gmra.mxu0 %vm56_vm0, %v22_v16  ;;  %818 = vmatmul.mubr.msk.f32.gmra.mxu1 %vm56_vm0, %v38_v17  ;;  %v45_v31 = vld [vmem:[%s1058_s0 + $0xf0] sm:$0xff]  ;;  %v30_v32 = vld [vmem:[%s1058_s0 + $0x78] sm:$0xff]  ;;  %v1021_v35 = vld [vmem:[%s1060_s2] ss:$0 sm:$0xff] }
  0x14   :  { %796 = vmatprep.mubr.msk.f32.mxu0 %vm56_vm0, %v23_v18  ;;  %820 = vmatprep.mubr.msk.f32.mxu1 %vm56_vm0, %v39_v19  ;;  %v46_v33 = vld [vmem:[%s1058_s0 + $0xf8] sm:$0xff]  ;;  %s861_s0 = smov [#allocation2]  }
  0x15   :  { %s543_s2 = sshll.u32 %s861_s0, 4  ;;  %s544_s2 = int_to_ptr.vmem [resolvable:$true] %s543_s2 }
  0x16   :  { %s839_s25 = scalar_lea.vmem %s544_s2, 2048  ;;  %p844_p1 = scmp.lt.s32.totalorder %s544_s2, %s544_s2 }
  0x17   :  { %797 = vmatmul.mubr.msk.f32.gmra.mxu0 %vm56_vm0, %v24_v20  ;;  %821 = vmatmul.mubr.msk.f32.gmra.mxu1 %vm56_vm0, %v40_v21  ;;  %p840_p0 = scmp.ne.s32.totalorder %s544_s2, %s839_s25  ;;  %p845_p2 = scmp.lt.s32.totalorder %s839_s25, %s839_s25 }
  0x18   :  { %799 = vmatprep.mubr.msk.f32.mxu0 %vm56_vm0, %v25_v22  ;;  %823 = vmatprep.mubr.msk.f32.mxu1 %vm56_vm0, %v41_v23 }
  0x19   :  { %p846_p3 = por %p845_p2, %p844_p1 }
  0x1b   :  { %800 = vmatmul.mubr.msk.f32.gmra.mxu0 %vm56_vm0, %v26_v24  ;;  %824 = vmatmul.mubr.msk.f32.gmra.mxu1 %vm56_vm0, %v42_v25  ;;  %p847_p4 = pnand %p846_p3, %p840_p0 }
  0x1c   :  { %802 = vmatprep.mubr.msk.f32.mxu0 %vm56_vm0, %v27_v26  ;;  %826 = vmatprep.mubr.msk.f32.mxu1 %vm56_vm0, %v43_v27 }
  0x1f   :  { %803 = vmatmul.mubr.msk.f32.gmra.mxu0 %vm56_vm0, %v28_v28  ;;  %827 = vmatmul.mubr.msk.f32.gmra.mxu1 %vm56_vm0, %v44_v29 }
  0x20   :  { %805 = vmatprep.mubr.msk.f32.mxu0 %vm56_vm0, %v29_v30  ;;  %829 = vmatprep.mubr.msk.f32.mxu1 %vm56_vm0, %v45_v31 }
  0x23   :  { %806 = vmatmul.mubr.msk.f32.gmra.mxu0 %vm56_vm0, %v30_v32  ;;  %830 = vmatmul.mubr.msk.f32.gmra.mxu1 %vm56_vm0, %v46_v33 }
  0xc7   :  { %v786_v34 = vpop.f32.mrf.mxu0  ;;  %v810_v36 = vpop.f32.mrf.mxu1 }
  0xc8   :  { %v225_v39 = vadd.f32 %v786_v34, %v1021_v35  ;;  %v305_v40 = vadd.f32 %v810_v36, %v1021_v35 }
  0xc9   :  { %v219_v37 = vpop.f32.mrf.mxu0  ;;  %v299_v38 = vpop.f32.mrf.mxu1 }
  0xca   :  { %v220_v41 = vadd.f32 %v1021_v35, %v219_v37  ;;  %v300_v42 = vadd.f32 %v1021_v35, %v299_v38 }
  0xcb   :  { %v789_v43 = vpop.f32.mrf.mxu0  ;;  %v813_v44 = vpop.f32.mrf.mxu1 }
  0xcc   :  { %v654_v45 = vpack.c.bf16 %v225_v39, %v220_v41  ;;  %v694_v46 = vpack.c.bf16 %v305_v40, %v300_v42  ;;  %v235_v49 = vadd.f32 %v789_v43, %v1021_v35  ;;  %v315_v50 = vadd.f32 %v813_v44, %v1021_v35 }
  0xcd   :  { %v229_v47 = vpop.f32.mrf.mxu0  ;;  %v309_v48 = vpop.f32.mrf.mxu1 }
  0xce   :  { %655 = vst [vmem:[#allocation2] sm:$0xff] %v654_v45   ;;  %738 = vst [vmem:[#allocation2 + $0x40] sm:$0xff] %v694_v46   ;;  %v230_v51 = vadd.f32 %v1021_v35, %v229_v47  ;;  %v310_v52 = vadd.f32 %v1021_v35, %v309_v48 }
  0xcf   :  { %v792_v53 = vpop.f32.mrf.mxu0  ;;  %v816_v54 = vpop.f32.mrf.mxu1 }
  0xd0   :  { %v659_v55 = vpack.c.bf16 %v235_v49, %v230_v51  ;;  %v699_v56 = vpack.c.bf16 %v315_v50, %v310_v52  ;;  %v245_v59 = vadd.f32 %v792_v53, %v1021_v35  ;;  %v325_v60 = vadd.f32 %v816_v54, %v1021_v35 }
  0xd1   :  { %v239_v57 = vpop.f32.mrf.mxu0  ;;  %v319_v58 = vpop.f32.mrf.mxu1 }
  0xd2   :  { %731 = vst [vmem:[#allocation2 + $0x8] sm:$0xff] %v659_v55   ;;  %739 = vst [vmem:[#allocation2 + $0x48] sm:$0xff] %v699_v56   ;;  %v240_v61 = vadd.f32 %v1021_v35, %v239_v57  ;;  %v320_v62 = vadd.f32 %v1021_v35, %v319_v58 }
  0xd3   :  { %v795_v63 = vpop.f32.mrf.mxu0  ;;  %v819_v0 = vpop.f32.mrf.mxu1 }
  0xd4   :  { %v664_v1 = vpack.c.bf16 %v245_v59, %v240_v61  ;;  %v704_v2 = vpack.c.bf16 %v325_v60, %v320_v62  ;;  %v255_v5 = vadd.f32 %v795_v63, %v1021_v35  ;;  %v335_v6 = vadd.f32 %v819_v0, %v1021_v35 }
  0xd5   :  { %v249_v3 = vpop.f32.mrf.mxu0  ;;  %v329_v4 = vpop.f32.mrf.mxu1 }
  0xd6   :  { %732 = vst [vmem:[#allocation2 + $0x10] sm:$0xff] %v664_v1   ;;  %740 = vst [vmem:[#allocation2 + $0x50] sm:$0xff] %v704_v2   ;;  %v250_v7 = vadd.f32 %v1021_v35, %v249_v3  ;;  %v330_v8 = vadd.f32 %v1021_v35, %v329_v4 }
  0xd7   :  { %v798_v9 = vpop.f32.mrf.mxu0  ;;  %v822_v10 = vpop.f32.mrf.mxu1 }
  0xd8   :  { %v669_v11 = vpack.c.bf16 %v255_v5, %v250_v7  ;;  %v709_v12 = vpack.c.bf16 %v335_v6, %v330_v8  ;;  %v265_v15 = vadd.f32 %v798_v9, %v1021_v35  ;;  %v345_v16 = vadd.f32 %v822_v10, %v1021_v35 }
  0xd9   :  { %v259_v13 = vpop.f32.mrf.mxu0  ;;  %v339_v14 = vpop.f32.mrf.mxu1 }
  0xda   :  { %733 = vst [vmem:[#allocation2 + $0x18] sm:$0xff] %v669_v11   ;;  %741 = vst [vmem:[#allocation2 + $0x58] sm:$0xff] %v709_v12   ;;  %v260_v17 = vadd.f32 %v1021_v35, %v259_v13  ;;  %v340_v18 = vadd.f32 %v1021_v35, %v339_v14 }
  0xdb   :  { %v801_v19 = vpop.f32.mrf.mxu0  ;;  %v825_v20 = vpop.f32.mrf.mxu1 }
  0xdc   :  { %v674_v21 = vpack.c.bf16 %v265_v15, %v260_v17  ;;  %v714_v22 = vpack.c.bf16 %v345_v16, %v340_v18  ;;  %v275_v25 = vadd.f32 %v801_v19, %v1021_v35  ;;  %v355_v26 = vadd.f32 %v825_v20, %v1021_v35 }
  0xdd   :  { %v269_v23 = vpop.f32.mrf.mxu0  ;;  %v349_v24 = vpop.f32.mrf.mxu1 }
  0xde   :  { %734 = vst [vmem:[#allocation2 + $0x20] sm:$0xff] %v674_v21   ;;  %742 = vst [vmem:[#allocation2 + $0x60] sm:$0xff] %v714_v22   ;;  %v270_v27 = vadd.f32 %v1021_v35, %v269_v23  ;;  %v350_v28 = vadd.f32 %v1021_v35, %v349_v24 }
  0xdf   :  { %v804_v29 = vpop.f32.mrf.mxu0  ;;  %v828_v30 = vpop.f32.mrf.mxu1 }
  0xe0   :  { %v679_v31 = vpack.c.bf16 %v275_v25, %v270_v27  ;;  %v719_v32 = vpack.c.bf16 %v355_v26, %v350_v28  ;;  %v285_v36 = vadd.f32 %v804_v29, %v1021_v35  ;;  %v365_v37 = vadd.f32 %v828_v30, %v1021_v35 }
  0xe1   :  { %v279_v33 = vpop.f32.mrf.mxu0  ;;  %v359_v34 = vpop.f32.mrf.mxu1 }
  0xe2   :  { %735 = vst [vmem:[#allocation2 + $0x28] sm:$0xff] %v679_v31   ;;  %743 = vst [vmem:[#allocation2 + $0x68] sm:$0xff] %v719_v32   ;;  %v280_v38 = vadd.f32 %v1021_v35, %v279_v33  ;;  %v360_v39 = vadd.f32 %v1021_v35, %v359_v34 }
  0xe3   :  { %v807_v40 = vpop.f32.mrf.mxu0  ;;  %v831_v41 = vpop.f32.mrf.mxu1 }
  0xe4   :  { %v684_v42 = vpack.c.bf16 %v285_v36, %v280_v38  ;;  %v724_v43 = vpack.c.bf16 %v365_v37, %v360_v39  ;;  %v295_v46 = vadd.f32 %v807_v40, %v1021_v35  ;;  %v375_v47 = vadd.f32 %v831_v41, %v1021_v35 }
  0xe5   :  { %v289_v44 = vpop.f32.mrf.mxu0  ;;  %v369_v45 = vpop.f32.mrf.mxu1 }
  0xe6   :  { %736 = vst [vmem:[#allocation2 + $0x30] sm:$0xff] %v684_v42   ;;  %744 = vst [vmem:[#allocation2 + $0x70] sm:$0xff] %v724_v43   ;;  %v290_v48 = vadd.f32 %v1021_v35, %v289_v44  ;;  %v370_v49 = vadd.f32 %v1021_v35, %v369_v45 }
  0xe8   :  { %v689_v50 = vpack.c.bf16 %v295_v46, %v290_v48  ;;  %v729_v51 = vpack.c.bf16 %v375_v47, %v370_v49 }
  0xea   :  { %737 = vst [vmem:[#allocation2 + $0x38] sm:$0xff] %v689_v50   ;;  %745 = vst [vmem:[#allocation2 + $0x78] sm:$0xff] %v729_v51  }
  0xeb   :  { %850 = shalt.err (!%p847_p4)
}
  0xec   :  { %s862_s26 = smov 64   ;;  %s863_s27 = smov 4  }
  0xed   :  { %549 = dma.vmem_to_hbm [thread:$0]  %s544_s2, 2048, %s1061_s3, [#allocation3], %s862_s26, %s862_s26, %s863_s27  }
  0xee   :  { %859 = dma.done.wait [#allocation3], 2048  }
  0xef   :  { %860 = vsyncadd [#allocation3], 4294965248 }
  0xf0   :  { %553 = vsyncpa [#allocation3], 1 }

</bundles_post_ra>
